<compile_context>
chip_gen: v6e
topology: v6e:2x2x1
jax: 0.10.0
libtpu: 0.0.40
codegen_flags: <defaults>
</compile_context>

<pallas_src>
import numpy as np
import jax
import jax.numpy as jnp
from jax.experimental import pallas as pl
from jax.experimental.pallas import tpu as pltpu


def _bounding_rect(polygon):
    """cv2.boundingRect semantics for integer point sets: returns (x, y, w, h)."""
    pts = np.asarray(polygon, dtype=np.int64)
    x_min, y_min = int(pts[:, 0].min()), int(pts[:, 1].min())
    x_max, y_max = int(pts[:, 0].max()), int(pts[:, 1].max())
    return x_min, y_min, x_max - x_min + 1, y_max - y_min + 1


def _mesh_split_kernel(blk_ref, img_ref, mean_ref, inv_std_ref, out_ref):
    # blk_ref: SMEM (n_cells, 2) int32 block indices; only used by the index_map.
    # img_ref / mean_ref / inv_std_ref: (C, cell_h, cell_w) VMEM tiles.
    # out_ref: (1, C, cell_h, cell_w) slab of the stacked NCHW output.
    del blk_ref
    out_ref[0] = ((img_ref[...] - mean_ref[...]) * inv_std_ref[...]).astype(out_ref.dtype)


def mesh_splitter_forward(img_nchw, meshgrid, mean, std):
    """Pallas MeshSplitter forward.

    Returns a stacked (n_cells, C, cell_h, cell_w) float32 array; `out[i][None]`
    is the i-th (1, C, h, w) patch the PyTorch generator would yield (already
    NCHW — no per-patch transpose needed).
    """
    img = jnp.squeeze(img_nchw, axis=0)          # img.squeeze() -> (C, H, W)
    C, H, W = img.shape

    rects = [_bounding_rect(m) for m in meshgrid]
    widths = {r[2] for r in rects}
    heights = {r[3] for r in rects}
    # TODO(synk): variable-sized / unaligned bounding rects would need
    # pl.Element / pl.BoundedSlice index maps; we require a regular, cell-aligned
    # mesh (every bounding rect has the same size and starts on a cell boundary).
    assert len(widths) == 1 and len(heights) == 1, "regular mesh required"
    cell_w, cell_h = widths.pop(), heights.pop()
    n_cells = len(rects)

    # Host-side bounds / alignment validation: in-kernel VMEM windows have no
    # runtime OOB check, so reject bad rects before launching.
    for x, y, w, h in rects:
        assert 0 <= y and y + h <= H and 0 <= x and x + w <= W, "rect out of bounds"
        assert y % cell_h == 0 and x % cell_w == 0, "rect must be cell-aligned"

    # Per-cell *block* indices, scalar-prefetched into SMEM for the index_map.
    blk_yx = jnp.asarray(
        np.array([[r[1] // cell_h, r[0] // cell_w] for r in rects], dtype=np.int32))

    # cell_transforms stand-in (Normalize): pre-broadcast once to the cell tile
    # shape — lane-dense, loaded once (constant block index), no in-kernel
    # broadcast_in_dim.  1/std precomputed host-side (multiply beats divide).
    mean_b = jnp.broadcast_to(
        jnp.asarray(mean, jnp.float32).reshape(C, 1, 1), (C, cell_h, cell_w))
    inv_std_b = jnp.broadcast_to(
        (1.0 / jnp.asarray(std, jnp.float32)).reshape(C, 1, 1), (C, cell_h, cell_w))

    grid_spec = pltpu.PrefetchScalarGridSpec(
        num_scalar_prefetch=1,
        grid=(n_cells,),
        in_specs=[
            # The crop itself: one (C, cell_h, cell_w) window per grid step,
            # DMA'd straight from the rect's block offset (no whole-image VMEM).
            pl.BlockSpec((C, cell_h, cell_w),
                         lambda i, blk: (0, blk[i, 0], blk[i, 1])),
            pl.BlockSpec((C, cell_h, cell_w), lambda i, blk: (0, 0, 0)),   # mean
            pl.BlockSpec((C, cell_h, cell_w), lambda i, blk: (0, 0, 0)),   # 1/std
        ],
        out_specs=pl.BlockSpec((1, C, cell_h, cell_w),
                               lambda i, blk: (i, 0, 0, 0)),
    )

    out = pl.pallas_call(
        _mesh_split_kernel,
        grid_spec=grid_spec,
        out_shape=jax.ShapeDtypeStruct((n_cells, C, cell_h, cell_w), jnp.float32),
        # Cells are independent -> shard the cell axis across TensorCores (v7x);
        # no-op on single-TC v5e/v6e.
        compiler_params=pltpu.CompilerParams(dimension_semantics=("parallel",)),
    )(blk_yx, img, mean_b, inv_std_b)
    # TODO(synk): for very small cells one could coarsen the grid to one
    # mesh-row per step (fewer, fatter DMAs) when the meshgrid is row-major.
    return out


def _reference(img_nchw, meshgrid, mean, std):
    img = jnp.squeeze(img_nchw, axis=0)
    C = img.shape[0]
    outs = []
    for m in meshgrid:
        x, y, w, h = _bounding_rect(m)
        crop = img[:, y:y + h, x:x + w]
        crop = (crop - mean.reshape(C, 1, 1)) / std.reshape(C, 1, 1)
        outs.append(crop[None])
    return outs


if __name__ == "__main__":
    key = jax.random.PRNGKey(0)

    # Small-but-lane-dense shapes: C=4, 3x3 mesh of (8, 128) cells -> 24x384 image.
    C = 4
    grid_shape = (3, 3)
    cell_h, cell_w = 8, 128
    H, W = grid_shape[0] * cell_h, grid_shape[1] * cell_w

    # Meshgrid: 4 corner points (x, y) per cell, inclusive corner coordinates so
    # cv2.boundingRect-style (max - min + 1) yields (cell_h, cell_w) rects.
    meshgrid = []
    for r in range(grid_shape[0]):
        for c in range(grid_shape[1]):
            x0, y0 = c * cell_w, r * cell_h
            x1, y1 = x0 + cell_w - 1, y0 + cell_h - 1
            meshgrid.append(((x0, y0), (x1, y0), (x1, y1), (x0, y1)))

    img = jax.random.uniform(key, (1, C, H, W), dtype=jnp.float32)

    # Deterministic "cell_transforms" (Normalize) parameters.
    mean = jnp.linspace(0.1, 0.4, C, dtype=jnp.float32)
    std = jnp.linspace(0.5, 0.8, C, dtype=jnp.float32)

    out = mesh_splitter_forward(img, meshgrid, mean, std)
    out = jax.block_until_ready(out)

    refs = _reference(img, meshgrid, mean, std)
    assert out.shape == (len(refs), C, cell_h, cell_w)
    for i, r in enumerate(refs):
        patch = out[i][None]          # the (1, C, h, w) patch the generator yields
        assert patch.shape == r.shape == (1, C, cell_h, cell_w)
        np.testing.assert_allclose(np.asarray(patch), np.asarray(r),
                                   rtol=1e-5, atol=1e-5)

    print("KERNEL_OK")
</pallas_src>

<mosaic_0001>
module attributes {stable_mosaic.version = 11 : i64} {
  func.func @_mesh_split_kernel(%arg0: i32, %arg1: memref<9x2xi32, #tpu.memory_space<smem>>, %arg2: memref<4x8x128xf32, #tpu.memory_space<vmem>>, %arg3: memref<4x8x128xf32, #tpu.memory_space<vmem>>, %arg4: memref<4x8x128xf32, #tpu.memory_space<vmem>>, %arg5: memref<1x4x8x128xf32, #tpu.memory_space<vmem>>) attributes {dimension_semantics = [#tpu.dimension_semantics<parallel>], iteration_bounds = array<i64: 9>, scalar_prefetch = 1 : i64, scratch_operands = 0 : i64, tpu.core_type = #tpu.core_type<tc>, window_params = [{transform_indices = @transform_0, window_bounds = array<i64: 4, 8, 128>}, {pipeline_mode = #tpu.pipeline_mode<synchronous>, transform_indices = @transform_1, window_bounds = array<i64: 4, 8, 128>}, {pipeline_mode = #tpu.pipeline_mode<synchronous>, transform_indices = @transform_2, window_bounds = array<i64: 4, 8, 128>}, {transform_indices = @transform_3, window_bounds = array<i64: 1, 4, 8, 128>}]} {
    %c0 = arith.constant 0 : index
    %c0_0 = arith.constant 0 : index
    %c0_1 = arith.constant 0 : index
    %0 = vector.load %arg2[%c0, %c0_0, %c0_1] : memref<4x8x128xf32, #tpu.memory_space<vmem>>, vector<4x8x128xf32>
    %c0_2 = arith.constant 0 : index
    %c0_3 = arith.constant 0 : index
    %c0_4 = arith.constant 0 : index
    %1 = vector.load %arg3[%c0_2, %c0_3, %c0_4] : memref<4x8x128xf32, #tpu.memory_space<vmem>>, vector<4x8x128xf32>
    %2 = arith.subf %0, %1 : vector<4x8x128xf32>
    %c0_5 = arith.constant 0 : index
    %c0_6 = arith.constant 0 : index
    %c0_7 = arith.constant 0 : index
    %3 = vector.load %arg4[%c0_5, %c0_6, %c0_7] : memref<4x8x128xf32, #tpu.memory_space<vmem>>, vector<4x8x128xf32>
    %4 = arith.mulf %2, %3 : vector<4x8x128xf32>
    %c0_8 = arith.constant 0 : index
    %c0_9 = arith.constant 0 : index
    %c0_10 = arith.constant 0 : index
    %c0_11 = arith.constant 0 : index
    %5 = vector.load %arg5[%c0_8, %c0_9, %c0_10, %c0_11] : memref<1x4x8x128xf32, #tpu.memory_space<vmem>>, vector<1x4x8x128xf32>
    %6 = vector.shape_cast %5 : vector<1x4x8x128xf32> to vector<4x8x128xf32>
    %7 = vector.shape_cast %4 : vector<4x8x128xf32> to vector<1x4x8x128xf32>
    tpu.vector_store %arg5[%c0_8, %c0_9, %c0_10, %c0_11], %7 {strides = array<i32>} : memref<1x4x8x128xf32, #tpu.memory_space<vmem>>, vector<1x4x8x128xf32>,
    return
  }
  func.func @transform_0(%arg0: i32, %arg1: memref<9x2xi32, #tpu.memory_space<smem>>) -> (i32, i32, i32) {
    %0 = arith.index_cast %arg0 : i32 to index
    %c0 = arith.constant 0 : index
    %1 = memref.load %arg1[%0, %c0] : memref<9x2xi32, #tpu.memory_space<smem>>
    %2 = arith.index_cast %arg0 : i32 to index
    %c1 = arith.constant 1 : index
    %3 = memref.load %arg1[%2, %c1] : memref<9x2xi32, #tpu.memory_space<smem>>
    %c0_i32 = arith.constant 0 : i32
    %c0_i32_0 = arith.constant 0 : i32
    return %c0_i32, %1, %3 : i32, i32, i32
  }
  func.func @transform_1(%arg0: i32, %arg1: memref<9x2xi32, #tpu.memory_space<smem>>) -> (i32, i32, i32) {
    %c0_i32 = arith.constant 0 : i32
    %c0_i32_0 = arith.constant 0 : i32
    %c0_i32_1 = arith.constant 0 : i32
    %c0_i32_2 = arith.constant 0 : i32
    return %c0_i32, %c0_i32_0, %c0_i32_1 : i32, i32, i32
  }
  func.func @transform_2(%arg0: i32, %arg1: memref<9x2xi32, #tpu.memory_space<smem>>) -> (i32, i32, i32) {
    %c0_i32 = arith.constant 0 : i32
    %c0_i32_0 = arith.constant 0 : i32
    %c0_i32_1 = arith.constant 0 : i32
    %c0_i32_2 = arith.constant 0 : i32
    return %c0_i32, %c0_i32_0, %c0_i32_1 : i32, i32, i32
  }
  func.func @transform_3(%arg0: i32, %arg1: memref<9x2xi32, #tpu.memory_space<smem>>) -> (i32, i32, i32, i32) {
    %c0_i32 = arith.constant 0 : i32
    %c0_i32_0 = arith.constant 0 : i32
    %c0_i32_1 = arith.constant 0 : i32
    %c0_i32_2 = arith.constant 0 : i32
    return %arg0, %c0_i32, %c0_i32_0, %c0_i32_1 : i32, i32, i32, i32
  }
}

</mosaic_0001>

<bundles_post_ra>
// kernel: tpu_custom_call.1
= control target key start
LH: loop header
LB: loop body
LE: loop exit
PB: predicated region body
PF: predicated region fallthrough
CT: control target
= control target key end

     0   :  { %s988_s0 = inlined_call_operand.vmem [shape: s32[9,2], index: 0, kind: input, shape index: {}]   ;;  %s989_s1 = inlined_call_operand.hbm [shape: f32[4,24,384], index: 1, kind: input, shape index: {}]   ;;  %s990_s2 = inlined_call_operand.hbm [shape: f32[4,8,128], index: 2, kind: input, shape index: {}]   ;;  %s991_s3 = inlined_call_operand.hbm [shape: f32[4,8,128], index: 3, kind: input, shape index: {}]   ;;  %s992_s4 = inlined_call_operand.hbm [shape: f32[9,4,8,128], index: 4, kind: output, shape index: {}]  }
   0x1   :  { %1000 = sst [smem:[#allocation22_spill]] %s990_s2  ;;  %s9_s17 = sshll.u32 %s988_s0, 4  ;;  %s10_s17 = int_to_ptr.vmem [resolvable:$true] %s9_s17 }
   0x2   :  { %1001 = sst [smem:[#allocation23_spill]] %s991_s3  ;;  %s505_s18 = scalar_lea.vmem %s10_s17, 256 }
   0x3   :  { %p506_p0 = scmp.ne.s32.totalorder %s10_s17, %s505_s18  ;;  %p510_p1 = scmp.lt.s32.totalorder %s10_s17, %s10_s17 }
   0x4   :  { %p511_p2 = scmp.lt.s32.totalorder %s505_s18, %s505_s18 }
   0x6   :  { %p512_p3 = por %p511_p2, %p510_p1 }
   0x8   :  { %p513_p4 = pnand %p512_p3, %p506_p0 }
   0xa   :  { %516 = shalt.err (!%p513_p4)  }
   0xb   :  { %s693_s19 = smov [#allocation3]  }
   0xc   :  { %12 = dma.vmem_to_smem %s10_s17, 256, %s693_s19, [#allocation2] }
   0xd   :  { %651 = dma.done.wait [#allocation2], 256 }
   0xe   :  { %652 = vsyncadd [#allocation2], 4294967040 }
   0xf   :  { %14 = sfence }
  0x10   :  { %15 = vsyncpa [#allocation5], 0 }
  0x11   :  { %17 = vsyncpa [#allocation5 + $0x1], 0 }
  0x12   :  { %18 = vsyncpa [#allocation8], 0 }
  0x13   :  { %19 = vsyncpa [#allocation6], 0 }
  0x14   :  { %21 = vsyncpa [#allocation6 + $0x1], 0  ;;  %s731_s20 = smov 0   ;;  %s733_s0 = smov 0  }
  0x15   :  { %s735_s21 = smov 0   ;;  %s737_s22 = smov 0  }
  0x16   :  { %s739_s23 = smov 0   ;;  %s741_s24 = smov 0  }
  0x17   :  { %s743_s25 = smov 0  }
  0x18 LB: > { %1002 = sst [smem:[#allocation19_spill]] %s675_s21  ;;  %s765_s26 = sadd.s32 4294967295, %s691_s25   ;;  %s691_s25 = sphi %s743_s25, %s1031_s25   ;;  %s687_s24 = sphi %s741_s24, %s1030_s24   ;;  %s683_s23 = sphi %s739_s23, %s1029_s23   ;;  %s679_s22 = sphi %s737_s22, %s1028_s22   ;;  %s675_s21 = sphi %s735_s21, %s1024_s21   ;;  %s671_s0 = sphi %s733_s0, %s1027_s0   ;;  %s667_s20 = sphi %s731_s20, %s1026_s20  }
  0x19   : > { %s768_s27 = sadd.s32 1, %s691_s25   ;;  %s376_s28 = sadd.s32 4294967294, %s691_s25  }
  0x1a   : > { %p51_p5 = scmp.ne.s32.totalorder %s687_s24, %s683_s23  ;;  %p57_p6 = scmp.ne.s32.totalorder %s683_s23, %s679_s22 }
  0x1b   : > { %p993_p7 = scmp.eq.s32.totalorder %s765_s26, 0  ;;  %s109_s29 = ssub.s32 %s691_s25, %s768_s27 }
  0x1c   : > { %p110_p10 = scmp.eq.s32.totalorder %s109_s29, 0  ;;  %s112_s5 = sadd.s32 1, %s675_s21 }
  0x1d   : > { %p780_p9 = por %p993_p7, %p57_p6  ;;  %p122_p11 = scmp.ne.s32.totalorder %s675_s21, %s671_s0 }
  0x1e   : > { %s788_s6 = scalar_select %p110_p10, %s675_s21, %s112_s5  }
  0x1f   : > { %s1003_s30 = scalar_select %p780_p9, 1, 0 }
  0x20   : > { %1004 = sst [smem:[#allocation20_spill]] %s788_s6  ;;  %p123_p12 = scmp.eq.s32.totalorder %s765_s26, 8 }
  0x21   : > { %p128_p13 = scmp.ne.s32.totalorder %s671_s0, %s667_s20  ;;  %p129_p0 = scmp.eq.s32.totalorder %s376_s28, 8 }
  0x22   : > { %p379_p1 = scmp.ge.s32.totalorder %s691_s25, 1  ;;  %p794_p2 = por %p123_p12, %p122_p11 }
  0x23   : > { %p136_p3 = scmp.lt.s32.totalorder %s691_s25, 10  ;;  %p799_p4 = por %p129_p0, %p128_p13 }
  0x24   : > { %s1005_s7 = scalar_select %p794_p2, 1, 0 }
  0x25   : > { %s1006_s8 = scalar_select %p799_p4, 1, 0 }
  0x26   : > { %p803_p6 = pnand %p379_p1, %p136_p3  ;;  %s694_s10 = smov [#allocation7]  }
  0x27   : > { %s148_s11 = sshll.u32 %s694_s10, 4  ;;  %s695_s13 = smov [#allocation9]   ;;  %s149_s11 = int_to_ptr.vmem [resolvable:$true] %s148_s11 }
  0x28   : > { %s1007_s9 = scalar_select %p803_p6, 1, 0 }
  0x29   : > { %p416_p10 = pneg %p803_p6  ;;  %s161_s14 = sshll.u32 %s695_s13, 4  ;;  %s162_s14 = int_to_ptr.vmem [resolvable:$true] %s161_s14 }
  0x2a   : > { %s816_s15 = sshll.u32 %s691_s25, 7  ;;  %s528_s16 = scalar_lea.vmem %s149_s11, 512 }
  0x2b   : > { %p811_p11 = pnand %p416_p10, %p993_p7  ;;  %p529_p13 = scmp.ne.s32.totalorder %s149_s11, %s528_s16 }
  0x2c   : > { %p536_p3 = scmp.lt.s32.totalorder %s149_s11, %s149_s11  ;;  %p537_p10 = scmp.lt.s32.totalorder %s528_s16, %s528_s16 }
  0x2d   : > { %p519_p12 = pneg %p811_p11 }
  0x2e   : > { %p538_p7 = por %p537_p10, %p536_p3 }
  0x2f   : > { %p531_p0 = pnand %p529_p13, %p519_p12 }
  0x31   : > { %p532_p1 = pneg %p531_p0 }
  0x33   : > { %p539_p8 = pnand %p538_p7, %p532_p1 }
  0x35   : > { %542 = shalt.err (!%p539_p8)
}
  0x36   : > { %s994_s17 = smov 128   ;;  %s995_s18 = smov 8  }
  0x37   : > { %s1009_s2 = sld [smem:[#allocation22_spill]]  ;;  %s554_s28 = scalar_lea.vmem %s162_s14, 512 }
  0x38   : > { %p555_p13 = scmp.ne.s32.totalorder %s162_s14, %s554_s28  ;;  %p562_p7 = scmp.lt.s32.totalorder %s162_s14, %s162_s14 }
  0x39   : > { %p563_p8 = scmp.lt.s32.totalorder %s554_s28, %s554_s28 }
  0x3a   : > { %p557_p0 = pnand %p555_p13, %p519_p12 }
  0x3b   : > { %p564_p1 = por %p563_p8, %p562_p7 }
  0x3c   : > { %p558_p3 = pneg %p557_p0 }
  0x3d   : > { %419 = dma.hbm_to_vmem [thread:$0]  (!%p811_p11), %s1009_s2, 512, %s149_s11, [#allocation8], %s994_s17, %s994_s17, %s995_s18  }
  0x3e   : > { %p565_p10 = pnand %p564_p1, %p558_p3 }
  0x40   : > { %568 = shalt.err (!%p565_p10)
}
  0x41   : > { %s1010_s3 = sld [smem:[#allocation23_spill]]  ;;  %s33_s11 = sadd.s32 1, %s816_s15 }
  0x42   : > { %s32_s10 = sld [smem:[#allocation3 + %s816_s15]]  ;;  %s397_s13 = sadd.s32 128, %s816_s15 }
  0x43   : > { %s34_s12 = sld [smem:[#allocation3 + %s33_s11]]  ;;  %s37_s19 = sadd.s32 1, %s397_s13 }
  0x44   : > { %s36_s16 = sld [smem:[#allocation3 + %s397_s13]]  ;;  %p1011_p12 = scmp.eq.s32.totalorder %s691_s25, 0 }
  0x45   : > { %s44_s13 = sadd.s32 1, %s687_s24  ;;  %s175_s2 = sand.u32 1, %s687_s24  }
  0x46   : > { %p850_p13 = por %p1011_p12, %p51_p5  ;;  %s383_s6 = sshll.u32 %s175_s2, 5 }
  0x47   : > { %422 = dma.hbm_to_vmem [thread:$0]  (!%p811_p11), %s1010_s3, 512, %s162_s14, [#allocation8], %s994_s17, %s994_s17, %s995_s18  }
  0x48   : > { %s38_s14 = sld [smem:[#allocation3 + %s37_s19]]  ;;  %p437_p11 = scmp.lt.s32.totalorder %s691_s25, 9 }
  0x49   : > { %s404_s29 = scalar_select %p850_p13, [#allocation3], [#allocation11] }
  0x4a   : > { %p859_p0 = pnand %p437_p11, %p850_p13  ;;  %s39_s5 = ssub.s32 %s32_s10, %s36_s16 }
  0x4b   : > { %s1033_s15 = smov (!%p850_p13, %s816_s15), 0  ;;  %s1035_s29 = smov (!%p437_p11, %s404_s29), [#allocation13] }
  0x4c   : > { %s1037_s15 = smov (!%p437_p11, %s1033_s15), 0  ;;  %s1039_s11 = smov (!%p850_p13, %s33_s11), 0 }
  0x4d   : > { %s406_s3 = scalar_select %p850_p13, [#allocation3], [#allocation12] }
  0x4e   : > { %s40_s17 = ssub.s32 %s34_s12, %s38_s14  ;;  %s181_s21 = sld [smem:[%s1035_s29 + %s1037_s15]] }
  0x4f   : > { %s41_s18 = sor.u32 %s40_s17, %s39_s5  ;;  %s1041_s3 = smov (!%p437_p11, %s406_s3), [#allocation14] }
  0x50   : > { %p42_p5 = scmp.eq.s32.totalorder %s41_s18, 0  ;;  %s1043_s11 = smov (!%p437_p11, %s1039_s11), 0 }
  0x51   : > { %s183_s17 = sld [smem:[%s1041_s3 + %s1043_s11]]  ;;  %s179_s10 = scalar_lea.vmem [#allocation4], %s383_s6 }
  0x52   : > { %s871_s19 = scalar_select %p42_p5, %s687_s24, %s44_s13  }
  0x53   : > { %s191_s12 = sshll.u32 %s179_s10, 4  ;;  %s892_s15 = scalar_lea.sflag [#allocation5], %s175_s2  ;;  %s885_s12 = int_to_ptr.vmem [resolvable:$true] %s191_s12 }
  0x54   : > { %1014 = sst [smem:[#allocation21_spill]] %s871_s19  ;;  %s399_s18 = smul.u32 3, %s181_s21 }
  0x55   : > { %p571_p7 = pneg %p859_p0  ;;  %s574_s6 = scalar_lea.hbm %s989_s1, 4608 }
  0x57   : > { %s188_s16 = sadd.s32 %s399_s18, %s183_s17 }
  0x58   : > { %s385_s14 = sshll.u32 %s188_s16, 7 }
  0x59   : > { %s890_s19 = scalar_lea.hbm %s989_s1, %s385_s14 }
  0x5a   : > { %s569_s22 = scalar_lea.hbm %s890_s19, 512  ;;  %p575_p10 = scmp.lt.s32.totalorder %s890_s19, %s989_s1 }
  0x5b   : > { %p570_p3 = scmp.ne.s32.totalorder %s890_s19, %s569_s22  ;;  %p576_p12 = scmp.lt.s32.totalorder %s574_s6, %s569_s22 }
  0x5d   : > { %p572_p8 = pnand %p571_p7, %p570_p3  ;;  %p577_p13 = por %p576_p12, %p575_p10 }
  0x5f   : > { %p573_p1 = pneg %p572_p8 }
  0x61   : > { %p578_p11 = pnand %p577_p13, %p573_p1 }
  0x63   : > { %581 = shalt.err (!%p578_p11)
}
  0x64   : > { %s582_s2 = scalar_lea.vmem %s885_s12, 512  ;;  %s698_s17 = smov [#allocation4]  }
  0x65   : > { %p583_p5 = scmp.ne.s32.totalorder %s885_s12, %s582_s2  ;;  %s587_s18 = sshll.u32 %s698_s17, 4  ;;  %s588_s18 = int_to_ptr.vmem [resolvable:$false] %s587_s18 }
  0x66   : > { %s589_s10 = scalar_lea.vmem %s588_s18, 1024  ;;  %p590_p8 = scmp.lt.s32.totalorder %s885_s12, %s588_s18 }
  0x67   : > { %p585_p4 = pnand %p583_p5, %p571_p7  ;;  %p591_p2 = scmp.lt.s32.totalorder %s589_s10, %s582_s2 }
  0x69   : > { %p586_p3 = pneg %p585_p4  ;;  %p592_p9 = por %p591_p2, %p590_p8 }
  0x6b   : > { %p593_p6 = pnand %p592_p9, %p586_p3 }
  0x6d   : > { %596 = shalt.err (!%p593_p6)
}
  0x6e   : > { %s699_s16 = smov 1152   ;;  %s1015_s14 = smov 8  }
  0x6f   : > { %s1016_s5 = smov 128   ;;  %p1017_p4 = scmp.ne.s32.totalorder %s1007_s9, 0 }
  0x70   : > { %430 = dma.hbm_to_vmem [thread:$0]  (!%p859_p0), %s890_s19, 512, %s885_s12, %s892_s15, %s699_s16, %s1016_s5, %s1015_s14  }
  0x71   : > { %203 = sbr.rel (%p1017_p4) target bundleno = 148 (0x94), region = 32  ;;  %s205_s13 = sand.u32 (!%p1017_p4), 1, %s683_s23  }
  0x72   : > { %s387_s22 = sshll.u32 (!%p1017_p4), %s205_s13, 5  ;;  %s206_s3 = scalar_lea.sflag (!%p1017_p4), [#allocation5], %s205_s13 }
  0x73   : > { %s209_s21 = scalar_lea.vmem (!%p1017_p4), [#allocation4], %s387_s22  ;;  %p1018_p9 = scmp.ne.s32.totalorder (!%p1017_p4), %s1003_s30, 0 }
  0x76   : > { %654 = dma.done.wait (%p1018_p9), %s206_s3, 512  }
  0x77   : > { %656 = vsyncadd (%p1018_p9), %s206_s3, 4294966784  ;;  %p1019_p2 = scmp.eq.s32.totalorder %s765_s26, 0 }
  0x79   : > { %658 = dma.done.wait (%p1019_p2), [#allocation8], 1024   ;;  %p1020_p6 = pmov %p1019_p2 }
  0x7a   : > { %s237_s9 = sand.u32 1, %s671_s0   ;;  %v244_v0 = vld [vmem:[%s209_s21] sm:$0xff]  ;;  %v245_v4 = vld [vmem:[%s209_s21 + $0x8] sm:$0xff]  ;;  %v246_v8 = vld [vmem:[%s209_s21 + $0x10] sm:$0xff]  ;;  %s398_s30 = sshll.u32 %s765_s26, 9 }
  0x7b   : > { %660 = vsyncadd (%p1020_p6), [#allocation8], 4294966272  ;;  %s390_s28 = sshll.u32 %s237_s9, 5  ;;  %v248_v1 = vld [vmem:[#allocation7] sm:$0xff]  ;;  %v249_v5 = vld [vmem:[#allocation7 + $0x8] sm:$0xff]  ;;  %s933_s11 = scalar_lea.hbm %s992_s4, %s398_s30 }
  0x7c   : > { %v256_v2 = vld [vmem:[#allocation9] sm:$0xff]  ;;  %v252_v3 = vsub.f32 %v244_v0, %v248_v1  ;;  %v257_v6 = vld [vmem:[#allocation9 + $0x8] sm:$0xff]  ;;  %v253_v7 = vsub.f32 %v245_v4, %v249_v5  ;;  %v250_v9 = vld [vmem:[#allocation7 + $0x10] sm:$0xff]  ;;  %s239_s19 = scalar_lea.vmem [#allocation10], %s390_s28  ;;  %s939_s26 = scalar_lea.sflag [#allocation6], %s237_s9 }
  0x7d   : > { %v258_v10 = vld [vmem:[#allocation9 + $0x10] sm:$0xff]  ;;  %s282_s12 = sshll.u32 %s239_s19, 4  ;;  %v254_v12 = vsub.f32 %v246_v8, %v250_v9  ;;  %v247_v13 = vld [vmem:[%s209_s21 + $0x18] sm:$0xff]  ;;  %p1021_p7 = scmp.ne.s32.totalorder %s1005_s7, 0  ;;  %s935_s12 = int_to_ptr.vmem [resolvable:$true] %s282_s12 }
  0x7e   : > { %v260_v11 = vmul.f32 %v256_v2, %v252_v3  ;;  %v251_v14 = vld [vmem:[#allocation7 + $0x18] sm:$0xff]  ;;  %v261_v16 = vmul.f32 %v257_v6, %v253_v7  ;;  %s597_s29 = scalar_lea.vmem %s935_s12, 512  ;;  %s700_s2 = smov [#allocation10]  }
  0x7f   : > { %v259_v15 = vld [vmem:[#allocation9 + $0x18] sm:$0xff]  ;;  %v255_v17 = vsub.f32 %v247_v13, %v251_v14  ;;  %v262_v18 = vmul.f32 %v258_v10, %v254_v12  ;;  %p598_p0 = scmp.ne.s32.totalorder %s935_s12, %s597_s29  ;;  %s601_s17 = sshll.u32 %s700_s2, 4  ;;  %s602_s17 = int_to_ptr.vmem [resolvable:$false] %s601_s17 }
  0x80   : > { %264 = vst [vmem:[%s239_s19] sm:$0xff] %v260_v11  ;;  %265 = vst [vmem:[%s239_s19 + $0x8] sm:$0xff] %v261_v16  ;;  %s603_s18 = scalar_lea.vmem %s602_s17, 1024  ;;  %p604_p12 = scmp.lt.s32.totalorder %s935_s12, %s602_s17 }
  0x81   : > { %v263_v19 = vmul.f32 %v259_v15, %v255_v17  ;;  %266 = vst [vmem:[%s239_s19 + $0x10] sm:$0xff] %v262_v18  ;;  %p599_p1 = pnand %p598_p0, %p1021_p7  ;;  %p605_p13 = scmp.lt.s32.totalorder %s603_s18, %s597_s29 }
  0x83   : > { %267 = vst [vmem:[%s239_s19 + $0x18] sm:$0xff] %v263_v19  ;;  %p600_p10 = pneg %p599_p1  ;;  %p606_p11 = por %p605_p13, %p604_p12 }
  0x85   : > { %p607_p5 = pnand %p606_p11, %p600_p10 }
  0x87   : > { %610 = shalt.err (!%p607_p5)
}
  0x88   : > { %s611_s10 = scalar_lea.hbm %s933_s11, 512  ;;  %s615_s5 = scalar_lea.hbm %s992_s4, 4608 }
  0x89   : > { %p612_p3 = scmp.ne.s32.totalorder %s933_s11, %s611_s10  ;;  %p616_p9 = scmp.lt.s32.totalorder %s933_s11, %s992_s4 }
  0x8a   : > { %p617_p2 = scmp.lt.s32.totalorder %s615_s5, %s611_s10 }
  0x8b   : > { %p613_p8 = pnand %p612_p3, %p1021_p7 }
  0x8c   : > { %p618_p6 = por %p617_p2, %p616_p9 }
  0x8d   : > { %p614_p4 = pneg %p613_p8 }
  0x8f   : > { %p619_p0 = pnand %p618_p6, %p614_p4 }
  0x91   : > { %622 = shalt.err (!%p619_p0)
}
  0x92   : > { %s701_s3 = smov 128   ;;  %s702_s21 = smov 8  }
  0x93   : > { %414 = dma.vmem_to_hbm [thread:$0]  (%p1021_p7), %s935_s12, 512, %s933_s11, %s939_s26, %s701_s3, %s701_s3, %s702_s21  }
  0x94 PF: > { %p440_p1 = scmp.ge.s32.totalorder %s691_s25, 2  ;;  %s297_s9 = sand.u32 1, %s667_s20  }
  0x95   : > { %p1022_p10 = scmp.ne.s32.totalorder %s1006_s8, 0  ;;  %s298_s28 = scalar_lea.sflag [#allocation6], %s297_s9 }
  0x97   : > { %p432_p12 = pnand %p440_p1, %p1022_p10 }
  0x99   : > { %p433_p13 = pneg %p432_p12 }
  0x9b   : > { %662 = dma.done.wait (%p433_p13), %s298_s28, 512  }
  0x9c   : > { %664 = vsyncadd (%p433_p13), %s298_s28, 4294966784  ;;  %s1023_s30 = sld [smem:[#allocation19_spill]]  ;;  %p24_p7 = scmp.ge.s32.totalorder %s768_s27, 11  }
  0x9d   : > { %s1024_s21 = sld [smem:[#allocation20_spill]]  ;;  %s1026_s20 = smov %s671_s0 }
  0x9e   : > { %s1025_s7 = sld [smem:[#allocation21_spill]]  ;;  %s1028_s22 = smov %s683_s23 }
  0x9f   : > { %s1029_s23 = smov %s687_s24  ;;  %s1031_s25 = smov %s768_s27 }
  0xa0   :  { %26 = sbr.rel (!%p24_p7) target bundleno = 24 (0x18), region = 85 }
  0xa2   : > { %s1027_s0 = smov %s1023_s30 }
  0xa4   : > { %s1030_s24 = smov %s1025_s7 }
  0xa5   :  { %303 = vsyncpa [#allocation5], 1 }
  0xa6   :  { %305 = vsyncpa [#allocation5 + $0x1], 1 }
  0xa7   :  { %306 = vsyncpa [#allocation8], 1 }
  0xa8   :  { %307 = vsyncpa [#allocation6], 1 }
  0xa9   :  { %309 = vsyncpa [#allocation6 + $0x1], 1 }

</bundles_post_ra>
